<compile_context>
chip_gen: v5e
topology: v5e:2x2
jax: 0.10.0
libtpu: 0.0.40
codegen_flags: <defaults>
</compile_context>

<pallas_src>
import functools

import jax
import jax.numpy as jnp
from jax.experimental import pallas as pl
from jax.experimental.pallas import tpu as pltpu


# ~20 MiB of double-buffered tiles, comfortably under the 32 MiB scoped-VMEM limit
# requested below (safe on every generation: v5e/v6e 128 MiB phys, v7x 64 MiB phys).
_TILE_VMEM_BUDGET = 20 * 1024 * 1024
_VMEM_LIMIT_BYTES = 32 * 1024 * 1024
_TN_CAP = 4096  # max lane-tile width when the feature dim has to be tiled


def _sublane_multiple(dtype) -> int:
    """Row-tile alignment so packed (sub-32-bit) dtypes fill whole sublanes."""
    itemsize = jnp.dtype(dtype).itemsize
    return 8 * max(1, 4 // itemsize)  # f32 -> 8, bf16 -> 16, int8/fp8 -> 32


def _pick_tn(N: int) -> int:
    """Column tile: full N unless it is huge; always a multiple of 128 (or full N)."""
    if N % 128 != 0 or N <= _TN_CAP:
        return N
    best = 128
    t = 128
    while t <= _TN_CAP:
        if N % t == 0:
            best = t
        t += 128
    return best


def _pick_tm(M: int, row_align: int, bytes_per_row: int, budget: int) -> int:
    """Largest row tile that divides M, is sublane-aligned, and fits the VMEM budget."""
    if M % row_align != 0:
        return M  # full-dim block is always legal (block dim == array dim)
    max_tm = max(row_align, budget // max(1, bytes_per_row))
    if M <= max_tm:
        return M
    tm = (max_tm // row_align) * row_align
    while tm >= row_align:
        if M % tm == 0:
            return tm
        tm -= row_align
    return M


def _mask_scalar_kernel(x_ref, w_ref, o_ref):
    # w_ref is a (1,) float32 scalar living in SMEM.
    w = w_ref[0].astype(o_ref.dtype)
    o_ref[...] = x_ref[...].astype(o_ref.dtype) * w


def _mask_vector_kernel(x_ref, w_ref, o_ref):
    # Broadcast multiply on the VPU: w block is (1, tn) or (tm, 1).
    o_ref[...] = x_ref[...].astype(o_ref.dtype) * w_ref[...].astype(o_ref.dtype)


@functools.partial(jax.jit, static_argnames=("mode",))
def mask_forward(x: jax.Array, weight: jax.Array, mode: str) -> jax.Array:
    """Pallas equivalent of Mask.forward: returns x * weight (broadcast)."""
    orig_shape = x.shape

    if mode in ("scalar", "vector_input"):
        # Broadcast is over the last dim only -> flatten leading dims into rows.
        x2 = x.reshape(-1, x.shape[-1]) if x.ndim != 2 else x
    elif mode == "vector_output":
        # TODO(synk): non-2-D vector_output (weight of shape (size[0],)) not supported here.
        if x.ndim != 2:
            raise ValueError("vector_output mode expects a 2-D input.")
        x2 = x
    else:
        raise ValueError(f"Unsupported mask mode: {mode}")

    M, N = x2.shape
    # PyTorch type promotion: bf16 activations * f32 mask -> f32 output.
    out_dtype = jnp.result_type(x.dtype, weight.dtype)

    tn = _pick_tn(N)
    row_align = max(_sublane_multiple(x.dtype), _sublane_multiple(out_dtype))
    if mode == "vector_output":
        row_align = max(row_align, _sublane_multiple(weight.dtype))
    # Double-buffered x tile + double-buffered out tile per grid step.
    bytes_per_row = 2 * tn * (jnp.dtype(x.dtype).itemsize + jnp.dtype(out_dtype).itemsize)
    tm = _pick_tm(M, row_align, bytes_per_row, _TILE_VMEM_BUDGET)

    grid = (M // tm, N // tn)
    x_spec = pl.BlockSpec((tm, tn), lambda i, j: (i, j))
    o_spec = pl.BlockSpec((tm, tn), lambda i, j: (i, j))

    if mode == "scalar":
        kernel = _mask_scalar_kernel
        # Keep the scalar in SMEM: no padded VMEM tile, no extra DMA double buffer.
        w_arg = jnp.reshape(weight, (1,)).astype(jnp.float32)  # exact for bf16/f32 weights
        w_spec = pl.BlockSpec(memory_space=pltpu.MemorySpace.SMEM)
    elif mode == "vector_input":
        kernel = _mask_vector_kernel
        w_arg = jnp.reshape(weight, (1, N))  # keep weight dtype (torch promotion)
        w_spec = pl.BlockSpec((1, tn), lambda i, j: (0, j))
    else:  # vector_output
        kernel = _mask_vector_kernel
        w_arg = jnp.reshape(weight, (M, 1))
        w_spec = pl.BlockSpec((tm, 1), lambda i, j: (i, 0))

    out = pl.pallas_call(
        kernel,
        out_shape=jax.ShapeDtypeStruct((M, N), out_dtype),
        grid=grid,
        in_specs=[x_spec, w_spec],
        out_specs=o_spec,
        compiler_params=pltpu.CompilerParams(
            dimension_semantics=("parallel", "parallel"),
            vmem_limit_bytes=_VMEM_LIMIT_BYTES,
        ),
    )(x2, w_arg)

    return out.reshape(orig_shape)


if __name__ == "__main__":
    # mask size (analogous to MaskConfig.size): 2-D (seq=16, hidden=128)
    M, N = 16, 128
    key = jax.random.PRNGKey(0)
    kx, ks, ki, ko = jax.random.split(key, 4)

    x = jax.random.normal(kx, (M, N), dtype=jnp.float32)

    # Deterministic parameter values (MaskConfig.value); torch default is ones,
    # here we use non-trivial values to exercise the broadcast paths.
    w_scalar = jax.random.normal(ks, (), dtype=jnp.float32)        # mode="scalar"
    w_vec_in = jax.random.normal(ki, (N,), dtype=jnp.float32)      # mode="vector_input"
    w_vec_out = jax.random.normal(ko, (M, 1), dtype=jnp.float32)   # mode="vector_output"

    cases = [
        ("scalar", x, w_scalar),
        ("vector_input", x, w_vec_in),
        ("vector_output", x, w_vec_out),
        # Mixed precision: bf16 activations * f32 mask -> f32 output (torch promotion).
        ("vector_input", x.astype(jnp.bfloat16), w_vec_in),
    ]

    for mode, xi, w in cases:
        out = jax.block_until_ready(mask_forward(xi, w, mode))
        ref = xi * w  # JAX broadcasting + promotion matches PyTorch here
        assert out.shape == ref.shape, (mode, out.shape, ref.shape)
        assert out.dtype == ref.dtype, (mode, out.dtype, ref.dtype)
        assert jnp.allclose(out, ref, atol=1e-6, rtol=1e-6), f"mismatch in mode={mode}"

    print("KERNEL_OK")
</pallas_src>

<mosaic_0001>
module attributes {stable_mosaic.version = 11 : i64} {
  func.func @_mask_scalar_kernel(%arg0: i32, %arg1: i32, %arg2: memref<16x128xf32, #tpu.memory_space<vmem>>, %arg3: memref<1xf32, #tpu.memory_space<smem>>, %arg4: memref<16x128xf32, #tpu.memory_space<vmem>>) attributes {dimension_semantics = [#tpu.dimension_semantics<parallel>, #tpu.dimension_semantics<parallel>], iteration_bounds = array<i64: 1, 1>, scalar_prefetch = 0 : i64, scratch_operands = 0 : i64, tpu.core_type = #tpu.core_type<tc>, window_params = [{transform_indices = @transform_0, window_bounds = array<i64: 16, 128>}, {transform_indices = @transform_1, window_bounds = array<i64: 1>}, {transform_indices = @transform_2, window_bounds = array<i64: 16, 128>}]} {
    %c0 = arith.constant 0 : index
    %0 = memref.load %arg3[%c0] : memref<1xf32, #tpu.memory_space<smem>>
    %c0_0 = arith.constant 0 : index
    %c0_1 = arith.constant 0 : index
    %1 = vector.load %arg2[%c0_0, %c0_1] : memref<16x128xf32, #tpu.memory_space<vmem>>, vector<16x128xf32>
    %2 = vector.broadcast %0 : f32 to vector<16x128xf32>
    %3 = arith.mulf %1, %2 : vector<16x128xf32>
    %c0_2 = arith.constant 0 : index
    %c0_3 = arith.constant 0 : index
    %4 = vector.load %arg4[%c0_2, %c0_3] : memref<16x128xf32, #tpu.memory_space<vmem>>, vector<16x128xf32>
    tpu.vector_store %arg4[%c0_2, %c0_3], %3 {strides = array<i32>} : memref<16x128xf32, #tpu.memory_space<vmem>>, vector<16x128xf32>,
    return
  }
  func.func @transform_0(%arg0: i32, %arg1: i32) -> (i32, i32) {
    %c0_i32 = arith.constant 0 : i32
    return %arg0, %arg1 : i32, i32
  }
  func.func @transform_1(%arg0: i32, %arg1: i32) -> i32 {
    %c0_i32 = arith.constant 0 : i32
    %c0_i32_0 = arith.constant 0 : i32
    return %c0_i32 : i32
  }
  func.func @transform_2(%arg0: i32, %arg1: i32) -> (i32, i32) {
    %c0_i32 = arith.constant 0 : i32
    return %arg0, %arg1 : i32, i32
  }
}

</mosaic_0001>

<bundles_post_ra>
// kernel: mask_forward.1
= control target key start
LH: loop header
LB: loop body
LE: loop exit
PB: predicated region body
PF: predicated region fallthrough
CT: control target
= control target key end

     0   :  { %8 = vsyncpa [#allocation4], 0  ;;  %s140_s0 = inlined_call_operand.hbm [shape: f32[16,128], index: 0, kind: input, shape index: {}]   ;;  %s141_s1 = inlined_call_operand.<no memory space> [shape: f32[1], index: 1, kind: input, shape index: {}]   ;;  %s142_s2 = inlined_call_operand.hbm [shape: f32[16,128], index: 2, kind: output, shape index: {}]  }
   0x1   :  { %9 = vsyncpa [#allocation5], 0  ;;  %s14_s11 = sshll.u32 %s140_s0, 4  ;;  %s112_s12 = smov [#allocation3]   ;;  %s15_s11 = int_to_ptr.hbm [resolvable:$true] %s14_s11 }
   0x2   :  { %s16_s13 = sshll.u32 %s112_s12, 4  ;;  %s113_s14 = smov 128   ;;  %s17_s13 = int_to_ptr.vmem [resolvable:$true] %s16_s13 }
   0x3   :  { %s114_s15 = smov 8  }
   0x4   :  { %22 = dma.hbm_to_vmem [thread:$0]  %s15_s11, 256, %s17_s13, [#allocation4], %s113_s14, %s113_s14, %s114_s15  }
   0x5   :  { %108 = dma.done.wait [#allocation4], 256  }
   0x6   :  { %109 = vsyncadd [#allocation4], 4294967040  ;;  %v32_v0 = vstv %s141_s1  ;;  %s115_s18 = smov [#allocation6]   ;;  %s43_s22 = sshll.u32 %s142_s2, 4  ;;  %v30_v1 = vld [vmem:[#allocation3] sm:$0xff]  ;;  %v31_v2 = vld [vmem:[#allocation3 + $0x8] sm:$0xff]  ;;  %s44_s22 = int_to_ptr.hbm [resolvable:$true] %s43_s22 }
   0x7   :  { %s41_s19 = sshll.u32 %s115_s18, 4  ;;  %v33_v3 = vmul.f32 %v32_v0, %v30_v1  ;;  %v34_v4 = vmul.f32 %v32_v0, %v31_v2  ;;  %s42_s19 = int_to_ptr.vmem [resolvable:$true] %s41_s19 }
   0x9   :  { %35 = vst [vmem:[#allocation6] sm:$0xff] %v33_v3 }
   0xa   :  { %36 = vst [vmem:[#allocation6 + $0x8] sm:$0xff] %v34_v4 }
   0xb   :  { %49 = dma.vmem_to_hbm [thread:$0]  %s42_s19, 256, %s44_s22, [#allocation5], %s113_s14, %s113_s14, %s114_s15  }
   0xc   :  { %110 = dma.done.wait [#allocation5], 256  }
   0xd   :  { %111 = vsyncadd [#allocation5], 4294967040 }
   0xe   :  { %54 = vsyncpa [#allocation4], 1 }
   0xf   :  { %55 = vsyncpa [#allocation5], 1 }

</bundles_post_ra>
